<compile_context>
chip_gen: v7x
topology: tpu7x:2x2x1
jax: 0.10.0
libtpu: 0.0.40
codegen_flags: <defaults>
</compile_context>

<pallas_src>
import functools

import jax
import jax.numpy as jnp
from jax.experimental import pallas as pl
from jax.experimental.pallas import tpu as pltpu

_LANE = 128
_SUBLANE = 8
_MiB = 1024 * 1024


def _round_up(x: int, m: int) -> int:
    return ((x + m - 1) // m) * m


def _vmem_budget_bytes() -> int:
    """Generation-aware VMEM budget: ~80% of physical per-core VMEM
    (~51 MiB on v7x's 64 MiB/TC, ~102 MiB on v5e/v6e's 128 MiB), leaving
    headroom for Mosaic internal scratch and pipeline bookkeeping."""
    phys = 0
    try:
        phys = int(getattr(pltpu.get_tpu_info(), "vmem_capacity_bytes", 0))
    except Exception:
        phys = 0
    if phys <= 0:
        phys = 64 * _MiB  # conservative (v7x-sized) fallback
    return int(phys * 0.8)


def _make_sae_kernel(n_enc: int, n_dec: int):
    """Fused kernel: x -> encoder -> (store latent) -> decoder -> decoded."""
    n_layers = n_enc + n_dec

    def kernel(*refs):
        # refs layout: [x, (W, b) * n_layers, decoded_out, latent_out]
        x_ref = refs[0]
        w_refs = [refs[1 + 2 * l] for l in range(n_layers)]
        b_refs = [refs[2 + 2 * l] for l in range(n_layers)]
        decoded_ref = refs[1 + 2 * n_layers]
        latent_ref = refs[2 + 2 * n_layers]

        # No unconditional f32 upcast: feed x in its stored dtype; the per-layer
        # .astype(w.dtype) below is the only cast before the MXU.
        h = x_ref[...]

        for li in range(n_layers):
            w_ref, b_ref = w_refs[li], b_refs[li]
            # MXU matmul in the weight's stored dtype, f32 accumulation.
            y = jnp.dot(h.astype(w_ref.dtype), w_ref[...],
                        preferred_element_type=jnp.float32)
            y = y + b_ref[...].astype(jnp.float32)

            last_enc = li == n_enc - 1
            last = li == n_layers - 1
            if last_enc:
                # sigmoid(y) == 0.5*(tanh(0.5*y)+1): keeps the transcendental
                # on the EUP slot, no VALU divide on the latent tile.
                act = 0.5 * (jnp.tanh(0.5 * y) + 1.0)
            elif last:
                act = y                                   # final decoder: no act
            else:
                act = jnp.maximum(y, 0.0)                 # ReLU

            if last_enc:
                # Store latent as soon as the encoder finishes (short live range).
                latent_ref[...] = act.astype(latent_ref.dtype)

            # Carry activations in the next layer's weight dtype: one cast per
            # layer, halves the intermediate VMEM/vreg footprint for bf16 models.
            h = act if last else act.astype(w_refs[li + 1].dtype)

        decoded_ref[...] = h.astype(decoded_ref.dtype)

    return kernel


@functools.partial(jax.jit,
                   static_argnames=("n_enc", "n_dec", "tb", "d_in", "d_latent",
                                    "vmem_limit"))
def _sae_pallas(x, padded_params, *, n_enc, n_dec, tb, d_in, d_latent, vmem_limit):
    n_layers = n_enc + n_dec
    dims_in_p = tuple(padded_params[2 * l].shape[0] for l in range(n_layers))
    dims_out_p = tuple(padded_params[2 * l].shape[1] for l in range(n_layers))
    d_in_p = dims_in_p[0]
    d_latent_p = dims_out_p[n_enc - 1]

    batch = x.shape[0]
    batch_p = _round_up(batch, tb)
    grid = (batch_p // tb,)

    # Aligned fast path: the pad / slice copies compile away entirely when the
    # input is already tile/lane aligned.
    if batch_p != batch or d_in_p != d_in:
        x_in = jnp.pad(x, ((0, batch_p - batch), (0, d_in_p - d_in)))
    else:
        x_in = x

    # Activations stream over the batch grid (default double-buffering); every
    # weight / bias has a constant index_map and is single-buffered so it is
    # DMA'd once and held resident at 1x its size in VMEM.
    in_specs = [pl.BlockSpec((tb, d_in_p), lambda i: (i, 0))]
    for l in range(n_layers):
        in_specs.append(pl.BlockSpec((dims_in_p[l], dims_out_p[l]),
                                     lambda i: (0, 0),
                                     pipeline_mode=pl.Buffered(1)))
        in_specs.append(pl.BlockSpec((1, dims_out_p[l]),
                                     lambda i: (0, 0),
                                     pipeline_mode=pl.Buffered(1)))
    out_specs = (
        pl.BlockSpec((tb, d_in_p), lambda i: (i, 0)),       # decoded
        pl.BlockSpec((tb, d_latent_p), lambda i: (i, 0)),   # latent
    )

    flops = 2 * batch_p * sum(di * do for di, do in zip(dims_in_p, dims_out_p))
    param_bytes = sum(int(p.size) * p.dtype.itemsize for p in padded_params)
    bytes_accessed = (x_in.size * x_in.dtype.itemsize + param_bytes
                      + batch_p * (d_in_p + d_latent_p) * x.dtype.itemsize)
    cost = pl.CostEstimate(flops=flops,
                           transcendentals=batch_p * d_latent_p,
                           bytes_accessed=bytes_accessed)

    decoded_p, latent_p = pl.pallas_call(
        _make_sae_kernel(n_enc, n_dec),
        out_shape=(
            jax.ShapeDtypeStruct((batch_p, d_in_p), x.dtype),      # decoded
            jax.ShapeDtypeStruct((batch_p, d_latent_p), x.dtype),  # latent
        ),
        grid=grid,
        in_specs=in_specs,
        out_specs=out_specs,
        compiler_params=pltpu.CompilerParams(
            dimension_semantics=("parallel",),   # shard batch tiles across TCs (v7x)
            vmem_limit_bytes=int(vmem_limit),
        ),
        cost_estimate=cost,
    )(x_in, *padded_params)

    decoded = (decoded_p if (batch_p == batch and d_in_p == d_in)
               else decoded_p[:batch, :d_in])
    latent = (latent_p if (batch_p == batch and d_latent_p == d_latent)
              else latent_p[:batch, :d_latent])
    return decoded, latent


class SAEPallas:
    """Fused SAE forward.

    Parameters are padded (lane-dense, multiples of 128) and optionally cast to
    `compute_dtype` ONCE at construction, so the per-call path only moves
    activations.  Padding invariants: padded weight rows/cols and bias lanes are
    zero, and padded output lanes are sliced off before returning, so the extra
    sigmoid(0)=0.5 lanes in the padded latent never reach the user or the
    decoder result.
    """

    def __init__(self, enc_params, dec_params, *, compute_dtype=None,
                 block_batch=512):
        self.n_enc = len(enc_params)
        self.n_dec = len(dec_params)
        params = list(enc_params) + list(dec_params)
        n_layers = len(params)

        self.d_in = int(params[0][0].shape[0])
        self.d_latent = int(params[self.n_enc - 1][0].shape[1])

        padded = []
        for (w, b) in params:
            if compute_dtype is not None:
                # bf16 x bf16 with f32 accumulation is the native MXU fast path.
                w = w.astype(compute_dtype)
                b = b.astype(compute_dtype)
            fi, fo = w.shape
            fi_p, fo_p = _round_up(fi, _LANE), _round_up(fo, _LANE)
            padded.append(jnp.pad(w, ((0, fi_p - fi), (0, fo_p - fo))))
            padded.append(jnp.pad(b.reshape(1, fo), ((0, 0), (0, fo_p - fo))))
        self.padded_params = tuple(padded)

        self.dims_in_p = tuple(int(self.padded_params[2 * l].shape[0])
                               for l in range(n_layers))
        self.dims_out_p = tuple(int(self.padded_params[2 * l].shape[1])
                                for l in range(n_layers))
        self.d_in_p = self.dims_in_p[0]
        self.d_latent_p = self.dims_out_p[self.n_enc - 1]
        self.param_bytes = sum(int(p.size) * p.dtype.itemsize
                               for p in self.padded_params)

        self.block_batch = int(block_batch)
        self.vmem_budget = _vmem_budget_bytes()

        # Resident (single-buffered) params plus a minimal batch tile must fit.
        if self.param_bytes + 4 * _MiB > self.vmem_budget:
            # TODO(synk): feature-dim tiling fallback (extra grid axis /
            # pltpu.emit_pipeline over the widest layer's K/N blocks) for SAEs
            # whose parameters exceed per-TC VMEM (hits first on v7x's 64 MiB).
            raise ValueError(
                f"SAE parameters ({self.param_bytes / _MiB:.1f} MiB padded) do not "
                f"fit the per-core VMEM budget ({self.vmem_budget / _MiB:.1f} MiB); "
                "feature-dim tiling is not implemented.")

    def _pick_batch_tile(self, batch: int, x_itemsize: int) -> int:
        max_feat = max(self.dims_in_p + self.dims_out_p)
        per_row = (2 * self.d_in_p * x_itemsize                            # x in (2x buf)
                   + 2 * (self.d_in_p + self.d_latent_p) * x_itemsize      # outs (2x buf)
                   + 8 * max_feat)                                         # f32 y + carried h
        avail = self.vmem_budget - self.param_bytes - 4 * _MiB
        tb_fit = max(_SUBLANE, (avail // per_row) // _SUBLANE * _SUBLANE)
        tb = min(self.block_batch, tb_fit, _round_up(batch, _SUBLANE))
        return int(max(_SUBLANE, (tb // _SUBLANE) * _SUBLANE))

    def __call__(self, x):
        tb = self._pick_batch_tile(int(x.shape[0]), int(x.dtype.itemsize))
        return _sae_pallas(x, self.padded_params,
                           n_enc=self.n_enc, n_dec=self.n_dec, tb=tb,
                           d_in=self.d_in, d_latent=self.d_latent,
                           vmem_limit=self.vmem_budget)


def init_sae_params(key, dim_list, dtype=jnp.float32):
    """Deterministic parameter init mirroring nn.Linear shapes.

    Returns (enc_params, dec_params), each a list of (W_t, b) with W_t shape
    (in, out) (pre-transposed so the kernel computes x @ W_t + b), b shape (out,).
    """
    n = len(dim_list)

    def linear(key, fan_in, fan_out):
        kw, kb = jax.random.split(key)
        bound = 1.0 / jnp.sqrt(jnp.float32(fan_in))
        w_t = jax.random.uniform(kw, (fan_in, fan_out), jnp.float32, -bound, bound)
        b = jax.random.uniform(kb, (fan_out,), jnp.float32, -bound, bound)
        return w_t.astype(dtype), b.astype(dtype)

    enc_dims = [(dim_list[i - 1], dim_list[i]) for i in range(1, n)]
    dec_dims = [(dim_list[i], dim_list[i - 1]) for i in range(n - 1, 0, -1)]

    keys = jax.random.split(key, len(enc_dims) + len(dec_dims))
    enc_params = [linear(keys[i], fi, fo) for i, (fi, fo) in enumerate(enc_dims)]
    dec_params = [linear(keys[len(enc_dims) + i], fi, fo)
                  for i, (fi, fo) in enumerate(dec_dims)]
    return enc_params, dec_params


def _reference_forward(x, enc_params, dec_params):
    """Plain-JAX reference mirroring the kernel's mixed-precision policy."""
    params = list(enc_params) + list(dec_params)
    n_enc, n_layers = len(enc_params), len(params)
    h = x
    latent = None
    for li, (w, b) in enumerate(params):
        y = jnp.dot(h.astype(w.dtype), w, preferred_element_type=jnp.float32)
        y = y + b.astype(jnp.float32)
        if li == n_enc - 1:
            act = 0.5 * (jnp.tanh(0.5 * y) + 1.0)
            latent = act.astype(x.dtype)
        elif li == n_layers - 1:
            act = y
        else:
            act = jnp.maximum(y, 0.0)
        h = act if li == n_layers - 1 else act.astype(params[li + 1][0].dtype)
    return h.astype(x.dtype), latent


if __name__ == "__main__":
    key = jax.random.PRNGKey(0)
    k1, k2, k3, k4 = jax.random.split(key, 4)

    # ---- test 1: f32 params, unaligned dims, batch not a multiple of the tile,
    #      multi-step grid (block_batch forced small) ----
    dim_list = [32, 16, 8]          # d0 -> d1 -> latent
    batch = 40
    enc_params, dec_params = init_sae_params(k1, dim_list, dtype=jnp.float32)
    x = jax.random.normal(k2, (batch, dim_list[0]), jnp.float32)

    sae = SAEPallas(enc_params, dec_params, block_batch=16)
    decoded, latent = jax.block_until_ready(sae(x))
    ref_decoded, ref_latent = _reference_forward(x, enc_params, dec_params)
    assert decoded.shape == (batch, dim_list[0])
    assert latent.shape == (batch, dim_list[-1])
    assert jnp.allclose(decoded, ref_decoded, atol=1e-4, rtol=1e-4)
    assert jnp.allclose(latent, ref_latent, atol=1e-4, rtol=1e-4)

    # ---- test 2: bf16 weights/inputs (MXU-native path), aligned fast path ----
    dim_list2 = [256, 128, 64]
    batch2 = 64
    enc2, dec2 = init_sae_params(k3, dim_list2, dtype=jnp.bfloat16)
    x2 = jax.random.normal(k4, (batch2, dim_list2[0]), jnp.float32).astype(jnp.bfloat16)

    sae2 = SAEPallas(enc2, dec2)
    decoded2, latent2 = jax.block_until_ready(sae2(x2))
    ref_decoded2, ref_latent2 = _reference_forward(x2, enc2, dec2)
    assert decoded2.shape == (batch2, dim_list2[0])
    assert latent2.shape == (batch2, dim_list2[-1])
    assert jnp.allclose(decoded2.astype(jnp.float32), ref_decoded2.astype(jnp.float32),
                        atol=5e-2, rtol=5e-2)
    assert jnp.allclose(latent2.astype(jnp.float32), ref_latent2.astype(jnp.float32),
                        atol=5e-2, rtol=5e-2)

    # ---- test 3: f32-stored params cast to bf16 compute dtype at construction ----
    sae3 = SAEPallas(enc_params, dec_params, compute_dtype=jnp.bfloat16)
    decoded3, latent3 = jax.block_until_ready(sae3(x))
    assert decoded3.shape == (batch, dim_list[0])
    assert latent3.shape == (batch, dim_list[-1])
    assert bool(jnp.all(jnp.isfinite(decoded3)))
    assert jnp.allclose(decoded3, ref_decoded, atol=0.2, rtol=0.2)

    # TODO(synk): save_checkpoint / load_checkpoint / n_params are host-side torch
    # checkpoint utilities with no kernel equivalent; omitted.
    print("KERNEL_OK")
</pallas_src>

<mosaic_0001>
module attributes {stable_mosaic.version = 11 : i64} {
  func.func @kernel(%arg0: i32, %arg1: memref<16x128xf32, #tpu.memory_space<vmem>>, %arg2: memref<128x128xf32, #tpu.memory_space<vmem>>, %arg3: memref<1x128xf32, #tpu.memory_space<vmem>>, %arg4: memref<128x128xf32, #tpu.memory_space<vmem>>, %arg5: memref<1x128xf32, #tpu.memory_space<vmem>>, %arg6: memref<128x128xf32, #tpu.memory_space<vmem>>, %arg7: memref<1x128xf32, #tpu.memory_space<vmem>>, %arg8: memref<128x128xf32, #tpu.memory_space<vmem>>, %arg9: memref<1x128xf32, #tpu.memory_space<vmem>>, %arg10: memref<16x128xf32, #tpu.memory_space<vmem>>, %arg11: memref<16x128xf32, #tpu.memory_space<vmem>>) attributes {dimension_semantics = [#tpu.dimension_semantics<parallel>], iteration_bounds = array<i64: 3>, scalar_prefetch = 0 : i64, scratch_operands = 0 : i64, tpu.core_type = #tpu.core_type<tc>, window_params = [{transform_indices = @transform_0, window_bounds = array<i64: 16, 128>}, {pipeline_mode = #tpu.pipeline_mode<synchronous>, transform_indices = @transform_1, window_bounds = array<i64: 128, 128>}, {pipeline_mode = #tpu.pipeline_mode<synchronous>, transform_indices = @transform_2, window_bounds = array<i64: 1, 128>}, {pipeline_mode = #tpu.pipeline_mode<synchronous>, transform_indices = @transform_3, window_bounds = array<i64: 128, 128>}, {pipeline_mode = #tpu.pipeline_mode<synchronous>, transform_indices = @transform_4, window_bounds = array<i64: 1, 128>}, {pipeline_mode = #tpu.pipeline_mode<synchronous>, transform_indices = @transform_5, window_bounds = array<i64: 128, 128>}, {pipeline_mode = #tpu.pipeline_mode<synchronous>, transform_indices = @transform_6, window_bounds = array<i64: 1, 128>}, {pipeline_mode = #tpu.pipeline_mode<synchronous>, transform_indices = @transform_7, window_bounds = array<i64: 128, 128>}, {pipeline_mode = #tpu.pipeline_mode<synchronous>, transform_indices = @transform_8, window_bounds = array<i64: 1, 128>}, {transform_indices = @transform_9, window_bounds = array<i64: 16, 128>}, {transform_indices = @transform_10, window_bounds = array<i64: 16, 128>}]} {
    %c0 = arith.constant 0 : index
    %c0_0 = arith.constant 0 : index
    %0 = vector.load %arg1[%c0, %c0_0] : memref<16x128xf32, #tpu.memory_space<vmem>>, vector<16x128xf32>
    %c0_1 = arith.constant 0 : index
    %c0_2 = arith.constant 0 : index
    %1 = vector.load %arg2[%c0_1, %c0_2] : memref<128x128xf32, #tpu.memory_space<vmem>>, vector<128x128xf32>
    %cst = arith.constant dense<0.000000e+00> : vector<16x128xf32>
    %2 = tpu.matmul %0, %1, %cst {dimension_numbers = #tpu.dot_dimension_numbers<[1], [0], [0], [1], [0, 0, 1, 1], [], []>} : vector<16x128xf32>, vector<128x128xf32>, vector<16x128xf32> -> vector<16x128xf32>
    %c0_3 = arith.constant 0 : index
    %c0_4 = arith.constant 0 : index
    %3 = vector.load %arg3[%c0_3, %c0_4] : memref<1x128xf32, #tpu.memory_space<vmem>>, vector<1x128xf32>
    %4 = vector.broadcast %3 : vector<1x128xf32> to vector<16x128xf32>
    %5 = arith.addf %2, %4 : vector<16x128xf32>
    %cst_5 = arith.constant 0.000000e+00 : f32
    %6 = vector.broadcast %cst_5 : f32 to vector<16x128xf32>
    %7 = arith.maximumf %5, %6 : vector<16x128xf32>
    %c0_6 = arith.constant 0 : index
    %c0_7 = arith.constant 0 : index
    %8 = vector.load %arg4[%c0_6, %c0_7] : memref<128x128xf32, #tpu.memory_space<vmem>>, vector<128x128xf32>
    %cst_8 = arith.constant dense<0.000000e+00> : vector<16x128xf32>
    %9 = tpu.matmul %7, %8, %cst_8 {dimension_numbers = #tpu.dot_dimension_numbers<[1], [0], [0], [1], [0, 0, 1, 1], [], []>} : vector<16x128xf32>, vector<128x128xf32>, vector<16x128xf32> -> vector<16x128xf32>
    %c0_9 = arith.constant 0 : index
    %c0_10 = arith.constant 0 : index
    %10 = vector.load %arg5[%c0_9, %c0_10] : memref<1x128xf32, #tpu.memory_space<vmem>>, vector<1x128xf32>
    %11 = vector.broadcast %10 : vector<1x128xf32> to vector<16x128xf32>
    %12 = arith.addf %9, %11 : vector<16x128xf32>
    %cst_11 = arith.constant 5.000000e-01 : f32
    %13 = vector.broadcast %cst_11 : f32 to vector<16x128xf32>
    %14 = arith.mulf %13, %12 : vector<16x128xf32>
    %15 = math.tanh %14 : vector<16x128xf32>
    %cst_12 = arith.constant 1.000000e+00 : f32
    %16 = vector.broadcast %cst_12 : f32 to vector<16x128xf32>
    %17 = arith.addf %15, %16 : vector<16x128xf32>
    %cst_13 = arith.constant 5.000000e-01 : f32
    %18 = vector.broadcast %cst_13 : f32 to vector<16x128xf32>
    %19 = arith.mulf %18, %17 : vector<16x128xf32>
    %c0_14 = arith.constant 0 : index
    %c0_15 = arith.constant 0 : index
    %20 = vector.load %arg11[%c0_14, %c0_15] : memref<16x128xf32, #tpu.memory_space<vmem>>, vector<16x128xf32>
    tpu.vector_store %arg11[%c0_14, %c0_15], %19 {strides = array<i32>} : memref<16x128xf32, #tpu.memory_space<vmem>>, vector<16x128xf32>,
    %c0_16 = arith.constant 0 : index
    %c0_17 = arith.constant 0 : index
    %21 = vector.load %arg6[%c0_16, %c0_17] : memref<128x128xf32, #tpu.memory_space<vmem>>, vector<128x128xf32>
    %cst_18 = arith.constant dense<0.000000e+00> : vector<16x128xf32>
    %22 = tpu.matmul %19, %21, %cst_18 {dimension_numbers = #tpu.dot_dimension_numbers<[1], [0], [0], [1], [0, 0, 1, 1], [], []>} : vector<16x128xf32>, vector<128x128xf32>, vector<16x128xf32> -> vector<16x128xf32>
    %c0_19 = arith.constant 0 : index
    %c0_20 = arith.constant 0 : index
    %23 = vector.load %arg7[%c0_19, %c0_20] : memref<1x128xf32, #tpu.memory_space<vmem>>, vector<1x128xf32>
    %24 = vector.broadcast %23 : vector<1x128xf32> to vector<16x128xf32>
    %25 = arith.addf %22, %24 : vector<16x128xf32>
    %cst_21 = arith.constant 0.000000e+00 : f32
    %26 = vector.broadcast %cst_21 : f32 to vector<16x128xf32>
    %27 = arith.maximumf %25, %26 : vector<16x128xf32>
    %c0_22 = arith.constant 0 : index
    %c0_23 = arith.constant 0 : index
    %28 = vector.load %arg8[%c0_22, %c0_23] : memref<128x128xf32, #tpu.memory_space<vmem>>, vector<128x128xf32>
    %cst_24 = arith.constant dense<0.000000e+00> : vector<16x128xf32>
    %29 = tpu.matmul %27, %28, %cst_24 {dimension_numbers = #tpu.dot_dimension_numbers<[1], [0], [0], [1], [0, 0, 1, 1], [], []>} : vector<16x128xf32>, vector<128x128xf32>, vector<16x128xf32> -> vector<16x128xf32>
    %c0_25 = arith.constant 0 : index
    %c0_26 = arith.constant 0 : index
    %30 = vector.load %arg9[%c0_25, %c0_26] : memref<1x128xf32, #tpu.memory_space<vmem>>, vector<1x128xf32>
    %31 = vector.broadcast %30 : vector<1x128xf32> to vector<16x128xf32>
    %32 = arith.addf %29, %31 : vector<16x128xf32>
    %c0_27 = arith.constant 0 : index
    %c0_28 = arith.constant 0 : index
    %33 = vector.load %arg10[%c0_27, %c0_28] : memref<16x128xf32, #tpu.memory_space<vmem>>, vector<16x128xf32>
    tpu.vector_store %arg10[%c0_27, %c0_28], %32 {strides = array<i32>} : memref<16x128xf32, #tpu.memory_space<vmem>>, vector<16x128xf32>,
    return
  }
  func.func @transform_0(%arg0: i32) -> (i32, i32) {
    %c0_i32 = arith.constant 0 : i32
    %c0_i32_0 = arith.constant 0 : i32
    return %arg0, %c0_i32 : i32, i32
  }
  func.func @transform_1(%arg0: i32) -> (i32, i32) {
    %c0_i32 = arith.constant 0 : i32
    %c0_i32_0 = arith.constant 0 : i32
    %c0_i32_1 = arith.constant 0 : i32
    return %c0_i32, %c0_i32_0 : i32, i32
  }
  func.func @transform_2(%arg0: i32) -> (i32, i32) {
    %c0_i32 = arith.constant 0 : i32
    %c0_i32_0 = arith.constant 0 : i32
    %c0_i32_1 = arith.constant 0 : i32
    return %c0_i32, %c0_i32_0 : i32, i32
  }
  func.func @transform_3(%arg0: i32) -> (i32, i32) {
    %c0_i32 = arith.constant 0 : i32
    %c0_i32_0 = arith.constant 0 : i32
    %c0_i32_1 = arith.constant 0 : i32
    return %c0_i32, %c0_i32_0 : i32, i32
  }
  func.func @transform_4(%arg0: i32) -> (i32, i32) {
    %c0_i32 = arith.constant 0 : i32
    %c0_i32_0 = arith.constant 0 : i32
    %c0_i32_1 = arith.constant 0 : i32
    return %c0_i32, %c0_i32_0 : i32, i32
  }
  func.func @transform_5(%arg0: i32) -> (i32, i32) {
    %c0_i32 = arith.constant 0 : i32
    %c0_i32_0 = arith.constant 0 : i32
    %c0_i32_1 = arith.constant 0 : i32
    return %c0_i32, %c0_i32_0 : i32, i32
  }
  func.func @transform_6(%arg0: i32) -> (i32, i32) {
    %c0_i32 = arith.constant 0 : i32
    %c0_i32_0 = arith.constant 0 : i32
    %c0_i32_1 = arith.constant 0 : i32
    return %c0_i32, %c0_i32_0 : i32, i32
  }
  func.func @transform_7(%arg0: i32) -> (i32, i32) {
    %c0_i32 = arith.constant 0 : i32
    %c0_i32_0 = arith.constant 0 : i32
    %c0_i32_1 = arith.constant 0 : i32
    return %c0_i32, %c0_i32_0 : i32, i32
  }
  func.func @transform_8(%arg0: i32) -> (i32, i32) {
    %c0_i32 = arith.constant 0 : i32
    %c0_i32_0 = arith.constant 0 : i32
    %c0_i32_1 = arith.constant 0 : i32
    return %c0_i32, %c0_i32_0 : i32, i32
  }
  func.func @transform_9(%arg0: i32) -> (i32, i32) {
    %c0_i32 = arith.constant 0 : i32
    %c0_i32_0 = arith.constant 0 : i32
    return %arg0, %c0_i32 : i32, i32
  }
  func.func @transform_10(%arg0: i32) -> (i32, i32) {
    %c0_i32 = arith.constant 0 : i32
    %c0_i32_0 = arith.constant 0 : i32
    return %arg0, %c0_i32 : i32, i32
  }
}

</mosaic_0001>

<bundles_post_ra>
// kernel: _sae_pallas.1
= control target key start
LH: loop header
LB: loop body
LE: loop exit
PB: predicated region body
PF: predicated region fallthrough
CT: control target
= control target key end

     0   :  { %16 = vsyncpa [#allocation3], 0  ;;  %s1722_s0 = inlined_call_operand.vmem [shape: f32[48,128], index: 0, kind: input, shape index: {}]   ;;  %s1723_s1 = inlined_call_operand.vmem [shape: f32[128,128], index: 1, kind: input, shape index: {}]   ;;  %s1724_s2 = inlined_call_operand.vmem [shape: f32[1,128], index: 2, kind: input, shape index: {}]   ;;  %s1725_s3 = inlined_call_operand.hbm [shape: f32[128,128], index: 3, kind: input, shape index: {}]   ;;  %s1726_s4 = inlined_call_operand.vmem [shape: f32[1,128], index: 4, kind: input, shape index: {}]   ;;  %s1727_s5 = inlined_call_operand.hbm [shape: f32[128,128], index: 5, kind: input, shape index: {}]   ;;  %s1728_s6 = inlined_call_operand.vmem [shape: f32[1,128], index: 6, kind: input, shape index: {}]   ;;  %s1729_s7 = inlined_call_operand.hbm [shape: f32[128,128], index: 7, kind: input, shape index: {}]   ;;  %s1730_s8 = inlined_call_operand.vmem [shape: f32[1,128], index: 8, kind: input, shape index: {}]   ;;  %s1731_s9 = inlined_call_operand.vmem [shape: f32[48,128], index: 9, kind: output, shape index: {0}]   ;;  %s1732_s10 = inlined_call_operand.vmem [shape: f32[48,128], index: 10, kind: output, shape index: {1}]  }
   0x1   :  { %17 = vsyncpa [#allocation5], 0  ;;  %s1520_s13 = smov 0  }
   0x2 LB: > { %s952_s14 = sadd.s32 4294967295, %s1458_s13   ;;  %p954_p0 = scmp.ge.s32.totalorder %s1458_s13, 1  ;;  %s1458_s13 = sphi %s1520_s13, %s23_s13  }
   0x3   : > { %p274_p1 = scmp.lt.s32.totalorder %s1458_s13, 4  ;;  %p1530_p2 = scmp.eq.s32.totalorder %s952_s14, 0 }
   0x4   : > { %s1460_s17 = smov [#allocation4]   ;;  %s1461_s19 = smov [#allocation2]  }
   0x5   : > { %s1736_s15 = scalar_select %p1530_p2, 1, 0 }
   0x6   : > { %p1534_p3 = pnand %p954_p0, %p274_p1  ;;  %s308_s18 = sshll.u32 %s1460_s17, 4  ;;  %s309_s18 = int_to_ptr.vmem [resolvable:$true] %s308_s18 }
   0x7   : > { %s292_s20 = sshll.u32 %s1461_s19, 4  ;;  %s1462_s22 = smov [#allocation6]   ;;  %s1546_s20 = int_to_ptr.vmem [resolvable:$true] %s292_s20 }
   0x8   : > { %s1737_s16 = scalar_select %p1534_p3, 1, 0 }
   0x9   : > { %p1327_p4 = pneg %p1534_p3  ;;  %s324_s23 = sshll.u32 %s1462_s22, 4  ;;  %s1548_s23 = int_to_ptr.vmem [resolvable:$true] %s324_s23 }
   0xa   : > { %s1360_s26 = scalar_lea.hbm %s1727_s5, 2048 }
   0xb   : > { %p1542_p5 = pnand %p1530_p2, %p1327_p4  ;;  %p1361_p6 = scmp.ne.s32.totalorder %s1727_s5, %s1360_s26 }
   0xc   : > { %p1367_p10 = scmp.lt.u32.totalorder %s1360_s26, %s1727_s5 }
   0xd   : > { %p1558_p7 = pneg %p1542_p5 }
   0xf   : > { %p1363_p8 = pnand %p1558_p7, %p1361_p6 }
  0x11   : > { %p1364_p9 = pneg %p1363_p8 }
  0x13   : > { %p1369_p11 = pnand %p1367_p10, %p1364_p9 }
  0x15   : > { %1372 = shalt.err (!%p1369_p11)
}
  0x16   : > { %s1373_s12 = scalar_lea.vmem %s309_s18, 2048  ;;  %p1381_p1 = scmp.lt.s32.totalorder %s309_s18, %s309_s18 }
  0x17   : > { %p1374_p12 = scmp.ne.s32.totalorder %s309_s18, %s1373_s12  ;;  %p1382_p4 = scmp.lt.s32.totalorder %s1373_s12, %s1373_s12 }
  0x19   : > { %p1376_p13 = pnand %p1374_p12, %p1558_p7  ;;  %p1383_p2 = por %p1382_p4, %p1381_p1 }
  0x1b   : > { %p1377_p0 = pneg %p1376_p13 }
  0x1d   : > { %p1384_p3 = pnand %p1383_p2, %p1377_p0 }
  0x1f   : > { %1387 = shalt.err (!%p1384_p3)
}
  0x20   : > { %s1463_s17 = smov 128   ;;  %s1464_s19 = smov 8  }
  0x21   : > { %1333 = dma.hbm_to_vmem [thread:$0]  (!%p1542_p5), %s1727_s5, 2048, %s309_s18, [#allocation5], %s1463_s17, %s1463_s17, %s1464_s19  }
  0x22   : > { %s1388_s27 = scalar_lea.hbm %s1725_s3, 2048 }
  0x23   : > { %p1389_p2 = scmp.ne.s32.totalorder %s1725_s3, %s1388_s27  ;;  %p1395_p8 = scmp.lt.u32.totalorder %s1388_s27, %s1725_s3 }
  0x25   : > { %p1391_p3 = pnand %p1389_p2, %p1558_p7 }
  0x27   : > { %p1392_p6 = pneg %p1391_p3 }
  0x29   : > { %p1397_p9 = pnand %p1395_p8, %p1392_p6 }
  0x2b   : > { %1400 = shalt.err (!%p1397_p9)
}
  0x2c   : > { %s1401_s18 = scalar_lea.vmem %s1546_s20, 2048  ;;  %p1409_p13 = scmp.lt.s32.totalorder %s1546_s20, %s1546_s20 }
  0x2d   : > { %p1402_p10 = scmp.ne.s32.totalorder %s1546_s20, %s1401_s18  ;;  %p1410_p0 = scmp.lt.s32.totalorder %s1401_s18, %s1401_s18 }
  0x2f   : > { %p1404_p11 = pnand %p1402_p10, %p1558_p7  ;;  %p1411_p1 = por %p1410_p0, %p1409_p13 }
  0x31   : > { %p1405_p12 = pneg %p1404_p11 }
  0x33   : > { %p1412_p4 = pnand %p1411_p1, %p1405_p12 }
  0x35   : > { %1415 = shalt.err (!%p1412_p4)
}
  0x36   : > { %1330 = dma.hbm_to_vmem [thread:$0]  (!%p1542_p5), %s1725_s3, 2048, %s1546_s20, [#allocation3], %s1463_s17, %s1463_s17, %s1464_s19  }
  0x37   : > { %s1416_s27 = scalar_lea.hbm %s1729_s7, 2048 }
  0x38   : > { %p1417_p2 = scmp.ne.s32.totalorder %s1729_s7, %s1416_s27  ;;  %p1423_p8 = scmp.lt.u32.totalorder %s1416_s27, %s1729_s7 }
  0x3a   : > { %p1419_p3 = pnand %p1417_p2, %p1558_p7 }
  0x3c   : > { %p1420_p6 = pneg %p1419_p3 }
  0x3e   : > { %p1425_p9 = pnand %p1423_p8, %p1420_p6 }
  0x40   : > { %1428 = shalt.err (!%p1425_p9)
}
  0x41   : > { %s1429_s20 = scalar_lea.vmem %s1548_s23, 2048  ;;  %p1437_p13 = scmp.lt.s32.totalorder %s1548_s23, %s1548_s23 }
  0x42   : > { %p1430_p10 = scmp.ne.s32.totalorder %s1548_s23, %s1429_s20  ;;  %p1438_p0 = scmp.lt.s32.totalorder %s1429_s20, %s1429_s20 }
  0x44   : > { %p1432_p11 = pnand %p1430_p10, %p1558_p7  ;;  %p1439_p1 = por %p1438_p0, %p1437_p13 }
  0x46   : > { %p1433_p12 = pneg %p1432_p11 }
  0x48   : > { %p1440_p4 = pnand %p1439_p1, %p1433_p12 }
  0x4a   : > { %1443 = shalt.err (!%p1440_p4)
}
  0x4b   : > { %1336 = dma.hbm_to_vmem [thread:$0]  (!%p1542_p5), %s1729_s7, 2048, %s1548_s23, [#allocation5], %s1463_s17, %s1463_s17, %s1464_s19  }
  0x4c   : > { %p1740_p2 = scmp.ne.s32.totalorder %s1737_s16, 0 }
  0x4d   : > { %p1741_p7 = scmp.ne.s32.totalorder (!%p1740_p2), %s1736_s15, 0 }
  0x4e   : > { %352 = sbr.rel (%p1740_p2) target bundleno = 1008 (0x3f0), region = 56 }
  0x55   : > { %1449 = dma.done.wait (%p1741_p7), [#allocation3], 2048  }
  0x56   : > { %1451 = vsyncadd (%p1741_p7), [#allocation3], 4294965248 }
  0x57   : > { %1453 = dma.done.wait (%p1741_p7), [#allocation5], 4096  }
  0x58   : > { %1455 = vsyncadd (%p1741_p7), [#allocation5], 4294963200  ;;  %s963_s21 = sshll.u32 %s952_s14, 1  ;;  %v423_v0 = vld [vmem:[%s1723_s1] sm:$0xff]  ;;  %v424_v1 = vld [vmem:[%s1723_s1 + $0x8] sm:$0xff] }
  0x59   : > { %p404_p3 = scmp.lt.s32.totalorder %s963_s21, 5  ;;  %v425_v2 = vld [vmem:[%s1723_s1 + $0x10] sm:$0xff]  ;;  %v1187_v3 = vpack.c.bf16 %v424_v1, %v423_v0  ;;  %v426_v4 = vld [vmem:[%s1723_s1 + $0x18] sm:$0xff]  ;;  %v427_v6 = vld [vmem:[%s1723_s1 + $0x20] sm:$0xff] }
  0x5a   : > { %v1191_v5 = vpack.c.bf16 %v426_v4, %v425_v2  ;;  %v428_v7 = vld [vmem:[%s1723_s1 + $0x28] sm:$0xff]  ;;  %v429_v9 = vld [vmem:[%s1723_s1 + $0x30] sm:$0xff]  ;;  %v430_v10 = vld [vmem:[%s1723_s1 + $0x38] sm:$0xff] }
  0x5b   : > { %s1743_s21 = smov (!%p404_p3, %s963_s21), 5  ;;  %1188 = vmatprep.subr.bf16.mxu0 %v1187_v3  ;;  %v1195_v8 = vpack.c.bf16 %v428_v7, %v427_v6  ;;  %v523_v12 = vld [vmem:[#allocation2] sm:$0xff]  ;;  %v524_v13 = vld [vmem:[#allocation2 + $0x8] sm:$0xff]  ;;  %v525_v14 = vld [vmem:[#allocation2 + $0x10] sm:$0xff]  ;;  %v1199_v20 = vpack.c.bf16 %v430_v10, %v429_v9 }
  0x5c   : > { %s1641_s23 = sshll.u32 %s1743_s21, 3  ;;  %1190 = vmatpush3.bf16.msra.mxu0 %v1187_v3  ;;  %v1219_v15 = vpack.c.bf16 %v524_v13, %v523_v12  ;;  %v526_v16 = vld [vmem:[#allocation2 + $0x18] sm:$0xff]  ;;  %v527_v18 = vld [vmem:[#allocation2 + $0x20] sm:$0xff]  ;;  %v528_v19 = vld [vmem:[#allocation2 + $0x28] sm:$0xff] }
  0x5d   : > { %s1665_s20 = scalar_lea.vmem %s1722_s0, %s1641_s23  ;;  %1192 = vmatprep.subr.bf16.mxu0 %v1191_v5  ;;  %v1223_v17 = vpack.c.bf16 %v526_v16, %v525_v14  ;;  %v431_v21 = vld [vmem:[%s1723_s1 + $0x40] sm:$0xff]  ;;  %v432_v22 = vld [vmem:[%s1723_s1 + $0x48] sm:$0xff]  ;;  %v1227_v23 = vpack.c.bf16 %v528_v19, %v527_v18  ;;  %v529_v24 = vld [vmem:[#allocation2 + $0x30] sm:$0xff]  ;;  %s419_s25 = scalar_lea.vmem %s1732_s10, %s1641_s23 }
  0x5e   : > { %v421_v11 = vld [vmem:[%s1665_s20] sm:$0xff]  ;;  %1220 = vmatprep.subr.bf16.mxu1 %v1219_v15  ;;  %v530_v25 = vld [vmem:[#allocation2 + $0x38] sm:$0xff]  ;;  %v1203_v26 = vpack.c.bf16 %v432_v22, %v431_v21  ;;  %v433_v27 = vld [vmem:[%s1723_s1 + $0x50] sm:$0xff]  ;;  %s413_s11 = scalar_lea.vmem %s1731_s9, %s1641_s23 }
  0x5f   : > { %1079 = vmatprep.mubr.f32.mxu0 %v421_v11  ;;  %1222 = vmatpush3.bf16.msra.mxu1 %v1219_v15  ;;  %v434_v28 = vld [vmem:[%s1723_s1 + $0x58] sm:$0xff]  ;;  %v1231_v29 = vpack.c.bf16 %v530_v25, %v529_v24  ;;  %v531_v30 = vld [vmem:[#allocation2 + $0x40] sm:$0xff]  ;;  %v532_v31 = vld [vmem:[#allocation2 + $0x48] sm:$0xff] }
  0x60   : > { %1194 = vmatpush3.bf16.msra.mxu0 %v1191_v5  ;;  %1224 = vmatprep.subr.bf16.mxu1 %v1223_v17  ;;  %v1207_v32 = vpack.c.bf16 %v434_v28, %v433_v27  ;;  %v435_v33 = vld [vmem:[%s1723_s1 + $0x60] sm:$0xff]  ;;  %v436_v34 = vld [vmem:[%s1723_s1 + $0x68] sm:$0xff]  ;;  %v1235_v35 = vpack.c.bf16 %v532_v31, %v531_v30  ;;  %v533_v36 = vld [vmem:[#allocation2 + $0x50] sm:$0xff] }
  0x61   : > { %1196 = vmatprep.subr.bf16.mxu0 %v1195_v8  ;;  %v534_v37 = vld [vmem:[#allocation2 + $0x58] sm:$0xff]  ;;  %v1211_v38 = vpack.c.bf16 %v436_v34, %v435_v33  ;;  %v437_v39 = vld [vmem:[%s1723_s1 + $0x70] sm:$0xff]  ;;  %v535_v42 = vld [vmem:[#allocation2 + $0x60] sm:$0xff] }
  0x62   : > { %v438_v40 = vld [vmem:[%s1723_s1 + $0x78] sm:$0xff]  ;;  %v1239_v41 = vpack.c.bf16 %v534_v37, %v533_v36  ;;  %v536_v43 = vld [vmem:[#allocation2 + $0x68] sm:$0xff]  ;;  %v537_v47 = vld [vmem:[#allocation2 + $0x70] sm:$0xff] }
  0x63   : > { %1226 = vmatpush3.bf16.msra.mxu1 %v1223_v17  ;;  %v1215_v44 = vpack.c.bf16 %v438_v40, %v437_v39  ;;  %v1243_v45 = vpack.c.bf16 %v536_v43, %v535_v42  ;;  %v422_v46 = vld [vmem:[%s1665_s20 + $0x8] sm:$0xff]  ;;  %v538_v48 = vld [vmem:[#allocation2 + $0x78] sm:$0xff]  ;;  %v631_v50 = vld [vmem:[#allocation4] sm:$0xff] }
  0x64   : > { %1198 = vmatpush3.bf16.msra.mxu0 %v1195_v8  ;;  %1228 = vmatprep.subr.bf16.mxu1 %v1227_v23  ;;  %v1247_v49 = vpack.c.bf16 %v538_v48, %v537_v47  ;;  %v632_v51 = vld [vmem:[#allocation4 + $0x8] sm:$0xff]  ;;  %v633_v52 = vld [vmem:[#allocation4 + $0x10] sm:$0xff]  ;;  %v634_v54 = vld [vmem:[#allocation4 + $0x18] sm:$0xff] }
  0x65   : > { %1200 = vmatprep.subr.bf16.mxu0 %v1199_v20  ;;  %v1251_v53 = vpack.c.bf16 %v632_v51, %v631_v50  ;;  %v1255_v55 = vpack.c.bf16 %v634_v54, %v633_v52  ;;  %v635_v56 = vld [vmem:[#allocation4 + $0x20] sm:$0xff]  ;;  %v636_v57 = vld [vmem:[#allocation4 + $0x28] sm:$0xff]  ;;  %v637_v2 = vld [vmem:[#allocation4 + $0x30] sm:$0xff] }
  0x66   : > { %v1259_v58 = vpack.c.bf16 %v636_v57, %v635_v56  ;;  %v969_v59 = vld [vmem:[%s1724_s2] ss:$0 sm:$0xff]  ;;  %v638_v3 = vld [vmem:[#allocation4 + $0x38] sm:$0xff]  ;;  %v640_v6 = vld [vmem:[#allocation4 + $0x48] sm:$0xff] }
  0x67   : > { %1230 = vmatpush3.bf16.msra.mxu1 %v1227_v23  ;;  %v1263_v4 = vpack.c.bf16 %v638_v3, %v637_v2  ;;  %v639_v5 = vld [vmem:[#allocation4 + $0x40] sm:$0xff]  ;;  %v641_v8 = vld [vmem:[#allocation4 + $0x50] sm:$0xff]  ;;  %v642_v9 = vld [vmem:[#allocation4 + $0x58] sm:$0xff] }
  0x68   : > { %1202 = vmatpush3.bf16.msra.mxu0 %v1199_v20  ;;  %1232 = vmatprep.subr.bf16.mxu1 %v1231_v29  ;;  %v1267_v7 = vpack.c.bf16 %v640_v6, %v639_v5  ;;  %v1271_v10 = vpack.c.bf16 %v642_v9, %v641_v8  ;;  %v643_v11 = vld [vmem:[#allocation4 + $0x60] sm:$0xff]  ;;  %v644_v12 = vld [vmem:[#allocation4 + $0x68] sm:$0xff]  ;;  %v645_v14 = vld [vmem:[#allocation4 + $0x70] sm:$0xff] }
  0x69   : > { %1204 = vmatprep.subr.bf16.mxu0 %v1203_v26  ;;  %v1275_v13 = vpack.c.bf16 %v644_v12, %v643_v11  ;;  %v646_v15 = vld [vmem:[#allocation4 + $0x78] sm:$0xff]  ;;  %v731_v17 = vld [vmem:[#allocation6] sm:$0xff]  ;;  %v732_v18 = vld [vmem:[#allocation6 + $0x8] sm:$0xff] }
  0x6a   : > { %v1279_v16 = vpack.c.bf16 %v646_v15, %v645_v14  ;;  %v733_v19 = vld [vmem:[#allocation6 + $0x10] sm:$0xff]  ;;  %v1283_v20 = vpack.c.bf16 %v732_v18, %v731_v17  ;;  %v734_v21 = vld [vmem:[#allocation6 + $0x18] sm:$0xff]  ;;  %v735_v23 = vld [vmem:[#allocation6 + $0x20] sm:$0xff] }
  0x6b   : > { %1234 = vmatpush3.bf16.msra.mxu1 %v1231_v29  ;;  %v1287_v22 = vpack.c.bf16 %v734_v21, %v733_v19  ;;  %v736_v24 = vld [vmem:[#allocation6 + $0x28] sm:$0xff]  ;;  %v738_v27 = vld [vmem:[#allocation6 + $0x38] sm:$0xff]  ;;  %v739_v29 = vld [vmem:[#allocation6 + $0x40] sm:$0xff] }
  0x6c   : > { %1206 = vmatpush3.bf16.msra.mxu0 %v1203_v26  ;;  %1236 = vmatprep.subr.bf16.mxu1 %v1235_v35  ;;  %v1291_v25 = vpack.c.bf16 %v736_v24, %v735_v23  ;;  %v737_v26 = vld [vmem:[#allocation6 + $0x30] sm:$0xff]  ;;  %v740_v30 = vld [vmem:[#allocation6 + $0x48] sm:$0xff]  ;;  %v742_v33 = vld [vmem:[#allocation6 + $0x58] sm:$0xff] }
  0x6d   : > { %1208 = vmatprep.subr.bf16.mxu0 %v1207_v32  ;;  %v1295_v28 = vpack.c.bf16 %v738_v27, %v737_v26  ;;  %v1299_v31 = vpack.c.bf16 %v740_v30, %v739_v29  ;;  %v744_v36 = vld [vmem:[#allocation6 + $0x68] sm:$0xff]  ;;  %v745_v51 = vld [vmem:[#allocation6 + $0x70] sm:$0xff]  ;;  %v746_v52 = vld [vmem:[#allocation6 + $0x78] sm:$0xff] }
  0x6e   : > { %v971_v54 = vld [vmem:[%s1728_s6] ss:$0 sm:$0xff] }
  0x6f   : > { %1238 = vmatpush3.bf16.msra.mxu1 %v1235_v35  ;;  %v743_v35 = vld [vmem:[#allocation6 + $0x60] sm:$0xff] }
  0x70   : > { %1210 = vmatpush3.bf16.msra.mxu0 %v1207_v32  ;;  %1240 = vmatprep.subr.bf16.mxu1 %v1239_v41  ;;  %v741_v32 = vld [vmem:[#allocation6 + $0x50] sm:$0xff]  ;;  %v1307_v37 = vpack.c.bf16 %v744_v36, %v743_v35 }
  0x71   : > { %1212 = vmatprep.subr.bf16.mxu0 %v1211_v38  ;;  %v1303_v34 = vpack.c.bf16 %v742_v33, %v741_v32 }
  0x73   : > { %1242 = vmatpush3.bf16.msra.mxu1 %v1239_v41 }
  0x74   : > { %1214 = vmatpush3.bf16.msra.mxu0 %v1211_v38  ;;  %1244 = vmatprep.subr.bf16.mxu1 %v1243_v45  ;;  %v970_v38 = vld [vmem:[%s1726_s4] ss:$0 sm:$0xff] }
  0x75   : > { %1216 = vmatprep.subr.bf16.mxu0 %v1215_v44 }
  0x77   : > { %1246 = vmatpush3.bf16.msra.mxu1 %v1243_v45 }
  0x78   : > { %1218 = vmatpush3.bf16.msra.mxu0 %v1215_v44  ;;  %1248 = vmatprep.subr.bf16.mxu1 %v1247_v49 }
  0x79   : > { %1252 = vmatprep.subr.bf16.mxu0 %v1251_v53 }
  0x7b   : > { %1080 = vmatmul.mubr.f32.vlgmr.msra.gmra.mrb[0].mxu0 %v422_v46  ;;  %1250 = vmatpush3.bf16.msra.mxu1 %v1247_v49 }
  0x7c   : > { %1254 = vmatpush3.bf16.msra.mxu0 %v1251_v53  ;;  %1284 = vmatprep.subr.bf16.mxu1 %v1283_v20  ;;  %v1311_v53 = vpack.c.bf16 %v746_v52, %v745_v51 }
  0x7d   : > { %1256 = vmatprep.subr.bf16.mxu0 %v1255_v55 }
  0x80   : > { %1258 = vmatpush3.bf16.msra.mxu0 %v1255_v55 }
  0x81   : > { %1260 = vmatprep.subr.bf16.mxu0 %v1259_v58 }
  0x84   : > { %1262 = vmatpush3.bf16.msra.mxu0 %v1259_v58 }
  0x85   : > { %1264 = vmatprep.subr.bf16.mxu0 %v1263_v4 }
  0x88   : > { %1266 = vmatpush3.bf16.msra.mxu0 %v1263_v4 }
  0x89   : > { %1268 = vmatprep.subr.bf16.mxu0 %v1267_v7 }
  0x8c   : > { %1270 = vmatpush3.bf16.msra.mxu0 %v1267_v7 }
  0x8d   : > { %1272 = vmatprep.subr.bf16.mxu0 %v1271_v10 }
  0x90   : > { %1274 = vmatpush3.bf16.msra.mxu0 %v1271_v10 }
  0x91   : > { %1276 = vmatprep.subr.bf16.mxu0 %v1275_v13 }
  0x94   : > { %1278 = vmatpush3.bf16.msra.mxu0 %v1275_v13 }
  0x95   : > { %1280 = vmatprep.subr.bf16.mxu0 %v1279_v16 }
  0x98   : > { %1282 = vmatpush3.bf16.msra.mxu0 %v1279_v16 }
 0x14e   : > { %v1081_v60 = vpop.f32.mrb[0].mxu0 }
 0x14f   : > { %v518_v61 = vadd.f32 %v1081_v60, %v969_v59  ;;  %v512_v62 = vpop.f32.mrb[1].mxu0 }
 0x150   : > { %v513_v63 = vadd.f32 %v969_v59, %v512_v62 }
 0x151   : > { %v522_v1 = vmax.f32 %v518_v61, 0.0  ;;  %v972_v61 = vld [vmem:[%s1730_s8] ss:$0 sm:$0xff] }
 0x152   : > { %v521_v0 = vmax.f32 %v513_v63, 0.0 }
 0x154   : > { %1114 = vmatprep.mubr.f32.mxu1 %v521_v0 }
 0x155   : > { %1115 = vmatmul.mubr.f32.vlgmr.msra.gmra.mrb[0].mxu1 %v522_v1 }
 0x156   : > { %1286 = vmatpush3.bf16.msra.mxu1 %v1283_v20 }
 0x157   : > { %1288 = vmatprep.subr.bf16.mxu1 %v1287_v22 }
 0x15a   : > { %1290 = vmatpush3.bf16.msra.mxu1 %v1287_v22 }
 0x15b   : > { %1292 = vmatprep.subr.bf16.mxu1 %v1291_v25 }
 0x15e   : > { %1294 = vmatpush3.bf16.msra.mxu1 %v1291_v25 }
 0x15f   : > { %1296 = vmatprep.subr.bf16.mxu1 %v1295_v28 }
 0x162   : > { %1298 = vmatpush3.bf16.msra.mxu1 %v1295_v28 }
 0x163   : > { %1300 = vmatprep.subr.bf16.mxu1 %v1299_v31 }
 0x166   : > { %1302 = vmatpush3.bf16.msra.mxu1 %v1299_v31 }
 0x167   : > { %1304 = vmatprep.subr.bf16.mxu1 %v1303_v34 }
 0x16a   : > { %1306 = vmatpush3.bf16.msra.mxu1 %v1303_v34 }
 0x16b   : > { %1308 = vmatprep.subr.bf16.mxu1 %v1307_v37 }
 0x16e   : > { %1310 = vmatpush3.bf16.msra.mxu1 %v1307_v37 }
 0x16f   : > { %1312 = vmatprep.subr.bf16.mxu1 %v1311_v53 }
 0x172   : > { %1314 = vmatpush3.bf16.msra.mxu1 %v1311_v53 }
 0x228   : > { %v1116_v39 = vpop.f32.mrb[0].mxu1 }
 0x229   : > { %v618_v40 = vadd.f32 %v1116_v39, %v970_v38  ;;  %v612_v41 = vpop.f32.mrb[1].mxu1 }
 0x22a   : > { %v613_v42 = vadd.f32 %v970_v38, %v612_v41 }
 0x22b   : > { %v622_v43 = vmul.f32 0.5, %v618_v40 }
 0x22c   : > { %v621_v44 = vmul.f32 0.5, %v613_v42 }
 0x22d   : > { %1356 = vtanh.f32 %v622_v43 }
 0x22e   : > { %1358 = vtanh.f32 %v621_v44 }
 0x237   : > { %v1357_v45 = vpop.eup %1356 }
 0x238   : > { %v1359_v46 = vpop.eup %1358  ;;  %v626_v47 = vadd.f32 1.0, %v1357_v45 }
 0x239   : > { %v625_v48 = vadd.f32 1.0, %v1359_v46 }
 0x23a   : > { %v628_v50 = vmul.f32 0.5, %v626_v47 }
 0x23b   : > { %v627_v49 = vmul.f32 0.5, %v625_v48 }
 0x23c   : > { %630 = vst [vmem:[%s419_s25 + $0x8] sm:$0xff] %v628_v50 }
 0x23d   : > { %629 = vst [vmem:[%s419_s25] sm:$0xff] %v627_v49  ;;  %1149 = vmatprep.mubr.f32.mxu0 %v627_v49 }
 0x23e   : > { %1150 = vmatmul.mubr.f32.vlgmr.msra.gmra.mrb[2].mxu0 %v628_v50 }
 0x311   : > { %v1151_v55 = vpop.f32.mrb[2].mxu0 }
 0x312   : > { %v726_v56 = vadd.f32 %v1151_v55, %v971_v54  ;;  %v720_v57 = vpop.f32.mrb[3].mxu0 }
 0x313   : > { %v721_v58 = vadd.f32 %v971_v54, %v720_v57 }
 0x314   : > { %v730_v60 = vmax.f32 %v726_v56, 0.0 }
 0x315   : > { %v729_v59 = vmax.f32 %v721_v58, 0.0 }
 0x317   : > { %1184 = vmatprep.mubr.f32.mxu1 %v729_v59 }
 0x318   : > { %1185 = vmatmul.mubr.f32.vlgmr.msra.gmra.mrb[2].mxu1 %v730_v60 }
 0x3eb   : > { %v1186_v62 = vpop.f32.mrb[2].mxu1 }
 0x3ec   : > { %v820_v63 = vpop.f32.mrb[3].mxu1  ;;  %v826_v1 = vadd.f32 %v1186_v62, %v972_v61 }
 0x3ed   : > { %v821_v0 = vadd.f32 %v972_v61, %v820_v63 }
 0x3ee   : > { %830 = vst [vmem:[%s413_s11 + $0x8] sm:$0xff] %v826_v1 }
 0x3ef   : > { %829 = vst [vmem:[%s413_s11] sm:$0xff] %v821_v0 }
 0x3f0 PF: > { %s23_s13 = sadd.s32 1, %s1458_s13  }
 0x3f1   : > { %p20_p5 = scmp.ge.s32.totalorder %s23_s13, 5  }
 0x3f3   :  { %22 = sbr.rel (!%p20_p5) target bundleno = 2 (0x2), region = 111 }
 0x3fa   :  { %870 = vsyncpa [#allocation3], 1 }
 0x3fb   :  { %872 = vsyncpa [#allocation3 + $0x1], 1 }
 0x3fc   :  { %873 = vsyncpa [#allocation5], 1 }

</bundles_post_ra>
